<compile_context>
chip_gen: v5e
topology: v5e:2x2
jax: 0.10.0
libtpu: 0.0.40
codegen_flags: <defaults>
</compile_context>

<pallas_src>
import functools

import jax
import jax.numpy as jnp
from jax import lax
from jax.experimental import pallas as pl
from jax.experimental.pallas import tpu as pltpu


# ------------------------------ fused kernel --------------------------------

def _feature_net_kernel(x_ref, t1_ref, b1_ref, t2_ref, b2_ref,
                        sw1_ref, sw2_ref, d1_ref, gr_ref, gc_ref,
                        out_ref, *, nb, H, W, C1, C2):
    """Forward pass for one block of `nb` samples, fully batched.

    Activation layout: rows = (sample, h) stacked, columns = w*C + c
    (channel fastest).  All matmul operands are bf16, accumulation is f32.
    """
    f32, bf16 = jnp.float32, jnp.bfloat16
    Hp = H + 2
    H2, W2 = H // 2, W // 2
    H2p = H2 + 2
    W3 = W2 // 2
    R1 = nb * Hp - 2          # conv1 output slab rows (incl. boundary garbage)
    R2 = nb * H2p - 2         # conv2 output slab rows (incl. boundary garbage)

    # ---- conv1 (3x3 / pad 1) + ReLU: 3 row-shifted banded matmuls, batched ----
    acc1 = jnp.dot(x_ref[0:R1, :], t1_ref[0], preferred_element_type=f32)
    acc1 += jnp.dot(x_ref[1:R1 + 1, :], t1_ref[1], preferred_element_type=f32)
    acc1 += jnp.dot(x_ref[2:R1 + 2, :], t1_ref[2], preferred_element_type=f32)
    h1 = jnp.maximum(acc1 + b1_ref[...], 0.0)                      # [R1, W*C1] f32

    # ---- 2x2 maxpool: width via ONE selection matmul (even|odd concatenated) ----
    cm1 = jnp.dot(h1.astype(bf16), sw1_ref[...], preferred_element_type=f32)
    half1 = W2 * C1
    colmax1 = jnp.maximum(cm1[:, :half1], cm1[:, half1:])          # [R1, W2*C1]
    #          height via adjacent-row max on the VPU (no MXU)
    pairmax1 = jnp.maximum(colmax1[:-1, :], colmax1[1:, :])        # [R1-1, W2*C1]

    # ---- row decimation + zero row-ring + boundary-garbage removal: 1 matmul ----
    xpad2 = jnp.dot(d1_ref[...], pairmax1.astype(bf16),
                    preferred_element_type=f32).astype(bf16)       # [nb*H2p, W2*C1]

    # ---- conv2 (3x3 / pad 1; column padding baked into t2) + ReLU ----
    acc2 = jnp.dot(xpad2[0:R2, :], t2_ref[0], preferred_element_type=f32)
    acc2 += jnp.dot(xpad2[1:R2 + 1, :], t2_ref[1], preferred_element_type=f32)
    acc2 += jnp.dot(xpad2[2:R2 + 2, :], t2_ref[2], preferred_element_type=f32)
    h2 = jnp.maximum(acc2 + b2_ref[...], 0.0)                      # [R2, W2*C2]

    # ---- 2x2 maxpool (same scheme) ----
    cm2 = jnp.dot(h2.astype(bf16), sw2_ref[...], preferred_element_type=f32)
    half2 = W3 * C2
    colmax2 = jnp.maximum(cm2[:, :half2], cm2[:, half2:])          # [R2, W3*C2]
    pairmax2 = jnp.maximum(colmax2[:-1, :], colmax2[1:, :])        # [R2-1, W3*C2]

    # ---- global average pool fused into two tiny matmuls (rows, then columns) ----
    rows = jnp.dot(gr_ref[...], pairmax2.astype(bf16), preferred_element_type=f32)
    feat = jnp.dot(rows.astype(bf16), gc_ref[...], preferred_element_type=f32)
    out_ref[...] = feat.astype(out_ref.dtype)                      # [nb, C2]


# ---------------------- one-time weight / matrix construction ----------------

def _build_conv_T(w, width):
    """Banded weight matrices: 3x3/pad-1 conv = 3 row-shifted matmuls.

    w: [Cout, Cin, 3, 3] (PyTorch OIHW).  Returns T: [3, width*Cin, width*Cout]
    with T[di, wi*Cin + ci, wo*Cout + co] = w[co, ci, di, wi - wo + 1]
    (zero when the tap falls outside the kernel => column zero-padding baked in,
    so the conv input needs NO column padding and lives lane-dense at lane 0).
    """
    Cout, Cin, KH, KW = w.shape
    K = jnp.transpose(w, (2, 3, 1, 0)).astype(jnp.float32)            # [KH,KW,Cin,Cout]
    dj = jnp.arange(width)[:, None] - jnp.arange(width)[None, :] + 1  # [wi, wo]
    valid = (dj >= 0) & (dj < KW)
    T = K[:, jnp.clip(dj, 0, KW - 1)]                                 # [KH,wi,wo,Cin,Cout]
    T = jnp.where(valid[None, :, :, None, None], T, 0.0)
    return jnp.transpose(T, (0, 1, 3, 2, 4)).reshape(KH, width * Cin, width * Cout)


def _build_col_pool(width, c):
    """[width*c, 2*(width//2)*c]: left half = even-w selector, right = odd-w."""
    w = jnp.arange(width)[:, None]
    w2 = jnp.arange(width // 2)[None, :]
    eye = jnp.eye(c, dtype=jnp.float32)
    even = jnp.kron((w == 2 * w2).astype(jnp.float32), eye)
    odd = jnp.kron((w == 2 * w2 + 1).astype(jnp.float32), eye)
    return jnp.concatenate([even, odd], axis=1)


def _build_decimate_pad(nb, Hp, H2p, H2):
    """[nb*H2p, nb*Hp - 3] selector: copies pair-max row n*Hp + 2*i into padded
    conv2-input row n*H2p + 1 + i; pad-ring rows stay zero, garbage rows drop."""
    r = jnp.arange(nb * H2p)[:, None]
    c = jnp.arange(nb * Hp - 3)[None, :]
    n = r // H2p
    i = r % H2p - 1                       # -1 => top pad row, H2 => bottom pad row
    valid = (i >= 0) & (i < H2)
    return ((c == n * Hp + 2 * i) & valid).astype(jnp.float32)


def _build_row_gap(nb, H2p, H3):
    """[nb, nb*H2p - 3]: per-sample mean over the H3 selected pair-max rows."""
    n = jnp.arange(nb)[:, None]
    c = jnp.arange(nb * H2p - 3)[None, :]
    rel = c - n * H2p
    valid = (rel >= 0) & (rel < 2 * H3) & (rel % 2 == 0)
    return valid.astype(jnp.float32) / float(H3)


# ------------------------------- feature_net --------------------------------

def feature_net_forward(x, params, *, block_n=None):
    """Mirror of feature_net.forward: features -> global avg pool -> view(N,-1)."""
    w1, b1, w2, b2 = params
    N, Cin, H, W = x.shape
    C1, C2 = w1.shape[0], w2.shape[0]
    H2, W2 = H // 2, W // 2
    H3, W3 = H2 // 2, W2 // 2
    Hp, H2p = H + 2, H2 + 2

    # Samples per grid step: fully batched for small N; blocks of 8 for larger N
    # (grid axis is "parallel" -> shards across both TensorCores on v7x and
    #  gives HBM<->VMEM pipelining via BlockSpec as N grows).
    if block_n is None:
        block_n = N if (N <= 8 or N % 8 != 0) else 8
    assert N % block_n == 0, (N, block_n)
    nblocks = N // block_n

    bf16 = jnp.bfloat16
    # One-time boundary layout change: NCHW -> row-padded, row-major
    # [N*(H+2), W*Cin] (channel fastest), bf16 for the MXU.  Column padding is
    # baked into the banded weight matrices, so no column pad here.
    xrows = jnp.pad(jnp.transpose(x, (0, 2, 3, 1)).astype(jnp.float32),
                    ((0, 0), (1, 1), (0, 0), (0, 0)))
    xrows = xrows.reshape(N * Hp, W * Cin).astype(bf16)

    t1 = _build_conv_T(w1, W).astype(bf16)                  # [3, W*Cin,  W*C1]
    t2 = _build_conv_T(w2, W2).astype(bf16)                 # [3, W2*C1, W2*C2]
    b1row = jnp.tile(b1.astype(jnp.float32), W)[None, :]    # [1, W*C1]   (f32)
    b2row = jnp.tile(b2.astype(jnp.float32), W2)[None, :]   # [1, W2*C2]  (f32)
    sw1 = _build_col_pool(W, C1).astype(bf16)               # [W*C1,  2*W2*C1]
    sw2 = _build_col_pool(W2, C2).astype(bf16)              # [W2*C2, 2*W3*C2]
    d1 = _build_decimate_pad(block_n, Hp, H2p, H2).astype(bf16)
    gr = _build_row_gap(block_n, H2p, H3).astype(bf16)
    gc = (jnp.kron(jnp.ones((W3, 1), jnp.float32),
                   jnp.eye(C2, dtype=jnp.float32)) / float(W3)).astype(bf16)

    kernel = functools.partial(_feature_net_kernel, nb=block_n,
                               H=H, W=W, C1=C1, C2=C2)

    def fixed(shape):   # block-invariant operand: full array every grid step
        nd = len(shape)
        return pl.BlockSpec(shape, lambda i, _nd=nd: (0,) * _nd)

    return pl.pallas_call(
        kernel,
        out_shape=jax.ShapeDtypeStruct((N, C2), jnp.float32),
        grid=(nblocks,),
        in_specs=[
            pl.BlockSpec((block_n * Hp, W * Cin), lambda i: (i, 0)),   # x slab
            fixed(t1.shape), fixed(b1row.shape),
            fixed(t2.shape), fixed(b2row.shape),
            fixed(sw1.shape), fixed(sw2.shape),
            fixed(d1.shape), fixed(gr.shape), fixed(gc.shape),
        ],
        out_specs=pl.BlockSpec((block_n, C2), lambda i: (i, 0)),
        compiler_params=pltpu.CompilerParams(
            dimension_semantics=("parallel",)),
    )(xrows, t1, b1row, t2, b2row, sw1, sw2, d1, gr, gc)


# ------------------------------ pure-JAX reference ---------------------------

def _reference_forward(x, params):
    w1, b1, w2, b2 = params

    def conv_relu(h, w, b):
        out = lax.conv_general_dilated(
            h, w, window_strides=(1, 1), padding=((1, 1), (1, 1)),
            dimension_numbers=('NCHW', 'OIHW', 'NCHW'))
        return jax.nn.relu(out + b[None, :, None, None])

    def maxpool(h):
        return lax.reduce_window(h, -jnp.inf, lax.max,
                                 (1, 1, 2, 2), (1, 1, 2, 2), 'VALID')

    h = maxpool(conv_relu(x, w1, b1))
    h = maxpool(conv_relu(h, w2, b2))
    return jnp.mean(h, axis=(2, 3))


if __name__ == "__main__":
    key = jax.random.PRNGKey(0)
    kx, k1, k2, k3, k4, kx2 = jax.random.split(key, 6)

    # small shapes consistent with the module: batch=2, channels=4, spatial=16
    x = jax.random.normal(kx, (2, 4, 16, 16), dtype=jnp.float32)

    # deterministic synthetic parameters (PyTorch conv weight layout)
    w1 = 0.1 * jax.random.normal(k1, (8, 4, 3, 3), dtype=jnp.float32)
    b1 = 0.1 * jax.random.normal(k2, (8,), dtype=jnp.float32)
    w2 = 0.1 * jax.random.normal(k3, (16, 8, 3, 3), dtype=jnp.float32)
    b2 = 0.1 * jax.random.normal(k4, (16,), dtype=jnp.float32)
    params = (w1, b1, w2, b2)

    fwd = jax.jit(feature_net_forward)
    out = jax.block_until_ready(fwd(x, params))
    assert out.shape == (2, 16), out.shape
    assert out.dtype == jnp.float32

    ref = jax.block_until_ready(_reference_forward(x, params))
    # bf16 MXU operands with f32 accumulation -> slightly relaxed tolerance.
    err = float(jnp.max(jnp.abs(out - ref)))
    assert jnp.allclose(out, ref, atol=2e-2, rtol=2e-2), err

    # Larger batch: exercises the multi-block grid path (2 programs; would be
    # megacore-parallel on v7x) with 8 samples batched per block.
    x16 = jax.random.normal(kx2, (16, 4, 16, 16), dtype=jnp.float32)
    fwd_blk = jax.jit(functools.partial(feature_net_forward, block_n=8))
    out16 = jax.block_until_ready(fwd_blk(x16, params))
    ref16 = _reference_forward(x16, params)
    err16 = float(jnp.max(jnp.abs(out16 - ref16)))
    assert out16.shape == (16, 16)
    assert jnp.allclose(out16, ref16, atol=2e-2, rtol=2e-2), err16

    print("KERNEL_OK")
</pallas_src>

<mosaic_0001>
module attributes {stable_mosaic.version = 11 : i64} {
  func.func @_feature_net_kernel(%arg0: i32, %arg1: memref<36x64xbf16, #tpu.memory_space<vmem>>, %arg2: memref<3x64x128xbf16, #tpu.memory_space<vmem>>, %arg3: memref<1x128xf32, #tpu.memory_space<vmem>>, %arg4: memref<3x64x128xbf16, #tpu.memory_space<vmem>>, %arg5: memref<1x128xf32, #tpu.memory_space<vmem>>, %arg6: memref<128x128xbf16, #tpu.memory_space<vmem>>, %arg7: memref<128x128xbf16, #tpu.memory_space<vmem>>, %arg8: memref<20x33xbf16, #tpu.memory_space<vmem>>, %arg9: memref<2x17xbf16, #tpu.memory_space<vmem>>, %arg10: memref<64x16xbf16, #tpu.memory_space<vmem>>, %arg11: memref<2x16xf32, #tpu.memory_space<vmem>>) attributes {dimension_semantics = [#tpu.dimension_semantics<parallel>], iteration_bounds = array<i64: 1>, scalar_prefetch = 0 : i64, scratch_operands = 0 : i64, tpu.core_type = #tpu.core_type<tc>, window_params = [{transform_indices = @transform_0, window_bounds = array<i64: 36, 64>}, {pipeline_mode = #tpu.pipeline_mode<synchronous>, transform_indices = @transform_1, window_bounds = array<i64: 3, 64, 128>}, {pipeline_mode = #tpu.pipeline_mode<synchronous>, transform_indices = @transform_2, window_bounds = array<i64: 1, 128>}, {pipeline_mode = #tpu.pipeline_mode<synchronous>, transform_indices = @transform_3, window_bounds = array<i64: 3, 64, 128>}, {pipeline_mode = #tpu.pipeline_mode<synchronous>, transform_indices = @transform_4, window_bounds = array<i64: 1, 128>}, {pipeline_mode = #tpu.pipeline_mode<synchronous>, transform_indices = @transform_5, window_bounds = array<i64: 128, 128>}, {pipeline_mode = #tpu.pipeline_mode<synchronous>, transform_indices = @transform_6, window_bounds = array<i64: 128, 128>}, {pipeline_mode = #tpu.pipeline_mode<synchronous>, transform_indices = @transform_7, window_bounds = array<i64: 20, 33>}, {pipeline_mode = #tpu.pipeline_mode<synchronous>, transform_indices = @transform_8, window_bounds = array<i64: 2, 17>}, {pipeline_mode = #tpu.pipeline_mode<synchronous>, transform_indices = @transform_9, window_bounds = array<i64: 64, 16>}, {transform_indices = @transform_10, window_bounds = array<i64: 2, 16>}]} {
    %c0 = arith.constant 0 : index
    %c0_0 = arith.constant 0 : index
    %0 = vector.load %arg1[%c0, %c0_0] : memref<36x64xbf16, #tpu.memory_space<vmem>>, vector<34x64xbf16>
    %c0_1 = arith.constant 0 : index
    %c0_2 = arith.constant 0 : index
    %c0_3 = arith.constant 0 : index
    %1 = vector.load %arg2[%c0_1, %c0_2, %c0_3] : memref<3x64x128xbf16, #tpu.memory_space<vmem>>, vector<1x64x128xbf16>
    %2 = vector.shape_cast %1 : vector<1x64x128xbf16> to vector<64x128xbf16>
    %cst = arith.constant dense<0.000000e+00> : vector<34x128xf32>
    %3 = tpu.matmul %0, %2, %cst {dimension_numbers = #tpu.dot_dimension_numbers<[1], [0], [0], [1], [0, 0, 1, 1], [], []>} : vector<34x64xbf16>, vector<64x128xbf16>, vector<34x128xf32> -> vector<34x128xf32>
    %c1 = arith.constant 1 : index
    %c0_4 = arith.constant 0 : index
    %4 = vector.load %arg1[%c1, %c0_4] : memref<36x64xbf16, #tpu.memory_space<vmem>>, vector<34x64xbf16>
    %c1_5 = arith.constant 1 : index
    %c0_6 = arith.constant 0 : index
    %c0_7 = arith.constant 0 : index
    %5 = vector.load %arg2[%c1_5, %c0_6, %c0_7] : memref<3x64x128xbf16, #tpu.memory_space<vmem>>, vector<1x64x128xbf16>
    %6 = vector.shape_cast %5 : vector<1x64x128xbf16> to vector<64x128xbf16>
    %cst_8 = arith.constant dense<0.000000e+00> : vector<34x128xf32>
    %7 = tpu.matmul %4, %6, %cst_8 {dimension_numbers = #tpu.dot_dimension_numbers<[1], [0], [0], [1], [0, 0, 1, 1], [], []>} : vector<34x64xbf16>, vector<64x128xbf16>, vector<34x128xf32> -> vector<34x128xf32>
    %8 = arith.addf %3, %7 : vector<34x128xf32>
    %c2 = arith.constant 2 : index
    %c0_9 = arith.constant 0 : index
    %9 = vector.load %arg1[%c2, %c0_9] : memref<36x64xbf16, #tpu.memory_space<vmem>>, vector<34x64xbf16>
    %c2_10 = arith.constant 2 : index
    %c0_11 = arith.constant 0 : index
    %c0_12 = arith.constant 0 : index
    %10 = vector.load %arg2[%c2_10, %c0_11, %c0_12] : memref<3x64x128xbf16, #tpu.memory_space<vmem>>, vector<1x64x128xbf16>
    %11 = vector.shape_cast %10 : vector<1x64x128xbf16> to vector<64x128xbf16>
    %cst_13 = arith.constant dense<0.000000e+00> : vector<34x128xf32>
    %12 = tpu.matmul %9, %11, %cst_13 {dimension_numbers = #tpu.dot_dimension_numbers<[1], [0], [0], [1], [0, 0, 1, 1], [], []>} : vector<34x64xbf16>, vector<64x128xbf16>, vector<34x128xf32> -> vector<34x128xf32>
    %13 = arith.addf %8, %12 : vector<34x128xf32>
    %c0_14 = arith.constant 0 : index
    %c0_15 = arith.constant 0 : index
    %14 = vector.load %arg3[%c0_14, %c0_15] : memref<1x128xf32, #tpu.memory_space<vmem>>, vector<1x128xf32>
    %15 = vector.broadcast %14 : vector<1x128xf32> to vector<34x128xf32>
    %16 = arith.addf %13, %15 : vector<34x128xf32>
    %cst_16 = arith.constant 0.000000e+00 : f32
    %17 = vector.broadcast %cst_16 : f32 to vector<34x128xf32>
    %18 = arith.maximumf %16, %17 : vector<34x128xf32>
    %19 = arith.truncf %18 : vector<34x128xf32> to vector<34x128xbf16>
    %c0_17 = arith.constant 0 : index
    %c0_18 = arith.constant 0 : index
    %20 = vector.load %arg6[%c0_17, %c0_18] : memref<128x128xbf16, #tpu.memory_space<vmem>>, vector<128x128xbf16>
    %cst_19 = arith.constant dense<0.000000e+00> : vector<34x128xf32>
    %21 = tpu.matmul %19, %20, %cst_19 {dimension_numbers = #tpu.dot_dimension_numbers<[1], [0], [0], [1], [0, 0, 1, 1], [], []>} : vector<34x128xbf16>, vector<128x128xbf16>, vector<34x128xf32> -> vector<34x128xf32>
    %22 = vector.extract_strided_slice %21 {offsets = [0, 0], sizes = [34, 64], strides = [1, 1]} : vector<34x128xf32> to vector<34x64xf32>
    %23 = vector.extract_strided_slice %21 {offsets = [0, 64], sizes = [34, 64], strides = [1, 1]} : vector<34x128xf32> to vector<34x64xf32>
    %24 = arith.maximumf %22, %23 : vector<34x64xf32>
    %25 = vector.extract_strided_slice %24 {offsets = [0, 0], sizes = [33, 64], strides = [1, 1]} : vector<34x64xf32> to vector<33x64xf32>
    %26 = vector.extract_strided_slice %24 {offsets = [1, 0], sizes = [33, 64], strides = [1, 1]} : vector<34x64xf32> to vector<33x64xf32>
    %27 = arith.maximumf %25, %26 : vector<33x64xf32>
    %c0_20 = arith.constant 0 : index
    %c0_21 = arith.constant 0 : index
    %28 = vector.load %arg8[%c0_20, %c0_21] : memref<20x33xbf16, #tpu.memory_space<vmem>>, vector<20x33xbf16>
    %29 = arith.truncf %27 : vector<33x64xf32> to vector<33x64xbf16>
    %cst_22 = arith.constant dense<0.000000e+00> : vector<20x64xf32>
    %30 = tpu.matmul %28, %29, %cst_22 {dimension_numbers = #tpu.dot_dimension_numbers<[1], [0], [0], [1], [0, 0, 1, 1], [], []>} : vector<20x33xbf16>, vector<33x64xbf16>, vector<20x64xf32> -> vector<20x64xf32>
    %31 = arith.truncf %30 : vector<20x64xf32> to vector<20x64xbf16>
    %32 = vector.extract_strided_slice %31 {offsets = [0, 0], sizes = [18, 64], strides = [1, 1]} : vector<20x64xbf16> to vector<18x64xbf16>
    %c0_23 = arith.constant 0 : index
    %c0_24 = arith.constant 0 : index
    %c0_25 = arith.constant 0 : index
    %33 = vector.load %arg4[%c0_23, %c0_24, %c0_25] : memref<3x64x128xbf16, #tpu.memory_space<vmem>>, vector<1x64x128xbf16>
    %34 = vector.shape_cast %33 : vector<1x64x128xbf16> to vector<64x128xbf16>
    %cst_26 = arith.constant dense<0.000000e+00> : vector<18x128xf32>
    %35 = tpu.matmul %32, %34, %cst_26 {dimension_numbers = #tpu.dot_dimension_numbers<[1], [0], [0], [1], [0, 0, 1, 1], [], []>} : vector<18x64xbf16>, vector<64x128xbf16>, vector<18x128xf32> -> vector<18x128xf32>
    %36 = vector.extract_strided_slice %31 {offsets = [1, 0], sizes = [18, 64], strides = [1, 1]} : vector<20x64xbf16> to vector<18x64xbf16>
    %c1_27 = arith.constant 1 : index
    %c0_28 = arith.constant 0 : index
    %c0_29 = arith.constant 0 : index
    %37 = vector.load %arg4[%c1_27, %c0_28, %c0_29] : memref<3x64x128xbf16, #tpu.memory_space<vmem>>, vector<1x64x128xbf16>
    %38 = vector.shape_cast %37 : vector<1x64x128xbf16> to vector<64x128xbf16>
    %cst_30 = arith.constant dense<0.000000e+00> : vector<18x128xf32>
    %39 = tpu.matmul %36, %38, %cst_30 {dimension_numbers = #tpu.dot_dimension_numbers<[1], [0], [0], [1], [0, 0, 1, 1], [], []>} : vector<18x64xbf16>, vector<64x128xbf16>, vector<18x128xf32> -> vector<18x128xf32>
    %40 = arith.addf %35, %39 : vector<18x128xf32>
    %41 = vector.extract_strided_slice %31 {offsets = [2, 0], sizes = [18, 64], strides = [1, 1]} : vector<20x64xbf16> to vector<18x64xbf16>
    %c2_31 = arith.constant 2 : index
    %c0_32 = arith.constant 0 : index
    %c0_33 = arith.constant 0 : index
    %42 = vector.load %arg4[%c2_31, %c0_32, %c0_33] : memref<3x64x128xbf16, #tpu.memory_space<vmem>>, vector<1x64x128xbf16>
    %43 = vector.shape_cast %42 : vector<1x64x128xbf16> to vector<64x128xbf16>
    %cst_34 = arith.constant dense<0.000000e+00> : vector<18x128xf32>
    %44 = tpu.matmul %41, %43, %cst_34 {dimension_numbers = #tpu.dot_dimension_numbers<[1], [0], [0], [1], [0, 0, 1, 1], [], []>} : vector<18x64xbf16>, vector<64x128xbf16>, vector<18x128xf32> -> vector<18x128xf32>
    %45 = arith.addf %40, %44 : vector<18x128xf32>
    %c0_35 = arith.constant 0 : index
    %c0_36 = arith.constant 0 : index
    %46 = vector.load %arg5[%c0_35, %c0_36] : memref<1x128xf32, #tpu.memory_space<vmem>>, vector<1x128xf32>
    %47 = vector.broadcast %46 : vector<1x128xf32> to vector<18x128xf32>
    %48 = arith.addf %45, %47 : vector<18x128xf32>
    %cst_37 = arith.constant 0.000000e+00 : f32
    %49 = vector.broadcast %cst_37 : f32 to vector<18x128xf32>
    %50 = arith.maximumf %48, %49 : vector<18x128xf32>
    %51 = arith.truncf %50 : vector<18x128xf32> to vector<18x128xbf16>
    %c0_38 = arith.constant 0 : index
    %c0_39 = arith.constant 0 : index
    %52 = vector.load %arg7[%c0_38, %c0_39] : memref<128x128xbf16, #tpu.memory_space<vmem>>, vector<128x128xbf16>
    %cst_40 = arith.constant dense<0.000000e+00> : vector<18x128xf32>
    %53 = tpu.matmul %51, %52, %cst_40 {dimension_numbers = #tpu.dot_dimension_numbers<[1], [0], [0], [1], [0, 0, 1, 1], [], []>} : vector<18x128xbf16>, vector<128x128xbf16>, vector<18x128xf32> -> vector<18x128xf32>
    %54 = vector.extract_strided_slice %53 {offsets = [0, 0], sizes = [18, 64], strides = [1, 1]} : vector<18x128xf32> to vector<18x64xf32>
    %55 = vector.extract_strided_slice %53 {offsets = [0, 64], sizes = [18, 64], strides = [1, 1]} : vector<18x128xf32> to vector<18x64xf32>
    %56 = arith.maximumf %54, %55 : vector<18x64xf32>
    %57 = vector.extract_strided_slice %56 {offsets = [0, 0], sizes = [17, 64], strides = [1, 1]} : vector<18x64xf32> to vector<17x64xf32>
    %58 = vector.extract_strided_slice %56 {offsets = [1, 0], sizes = [17, 64], strides = [1, 1]} : vector<18x64xf32> to vector<17x64xf32>
    %59 = arith.maximumf %57, %58 : vector<17x64xf32>
    %c0_41 = arith.constant 0 : index
    %c0_42 = arith.constant 0 : index
    %60 = vector.load %arg9[%c0_41, %c0_42] : memref<2x17xbf16, #tpu.memory_space<vmem>>, vector<2x17xbf16>
    %61 = arith.truncf %59 : vector<17x64xf32> to vector<17x64xbf16>
    %cst_43 = arith.constant dense<0.000000e+00> : vector<2x64xf32>
    %62 = tpu.matmul %60, %61, %cst_43 {dimension_numbers = #tpu.dot_dimension_numbers<[1], [0], [0], [1], [0, 0, 1, 1], [], []>} : vector<2x17xbf16>, vector<17x64xbf16>, vector<2x64xf32> -> vector<2x64xf32>
    %63 = arith.truncf %62 : vector<2x64xf32> to vector<2x64xbf16>
    %c0_44 = arith.constant 0 : index
    %c0_45 = arith.constant 0 : index
    %64 = vector.load %arg10[%c0_44, %c0_45] : memref<64x16xbf16, #tpu.memory_space<vmem>>, vector<64x16xbf16>
    %cst_46 = arith.constant dense<0.000000e+00> : vector<2x16xf32>
    %65 = tpu.matmul %63, %64, %cst_46 {dimension_numbers = #tpu.dot_dimension_numbers<[1], [0], [0], [1], [0, 0, 1, 1], [], []>} : vector<2x64xbf16>, vector<64x16xbf16>, vector<2x16xf32> -> vector<2x16xf32>
    %c0_47 = arith.constant 0 : index
    %c0_48 = arith.constant 0 : index
    %66 = vector.load %arg11[%c0_47, %c0_48] : memref<2x16xf32, #tpu.memory_space<vmem>>, vector<2x16xf32>
    tpu.vector_store %arg11[%c0_47, %c0_48], %65 {strides = array<i32>} : memref<2x16xf32, #tpu.memory_space<vmem>>, vector<2x16xf32>,
    return
  }
  func.func @transform_0(%arg0: i32) -> (i32, i32) {
    %c0_i32 = arith.constant 0 : i32
    %c0_i32_0 = arith.constant 0 : i32
    return %arg0, %c0_i32 : i32, i32
  }
  func.func @transform_1(%arg0: i32) -> (i32, i32, i32) {
    %c0_i32 = arith.constant 0 : i32
    %c0_i32_0 = arith.constant 0 : i32
    %c0_i32_1 = arith.constant 0 : i32
    %c0_i32_2 = arith.constant 0 : i32
    return %c0_i32, %c0_i32_0, %c0_i32_1 : i32, i32, i32
  }
  func.func @transform_2(%arg0: i32) -> (i32, i32) {
    %c0_i32 = arith.constant 0 : i32
    %c0_i32_0 = arith.constant 0 : i32
    %c0_i32_1 = arith.constant 0 : i32
    return %c0_i32, %c0_i32_0 : i32, i32
  }
  func.func @transform_3(%arg0: i32) -> (i32, i32, i32) {
    %c0_i32 = arith.constant 0 : i32
    %c0_i32_0 = arith.constant 0 : i32
    %c0_i32_1 = arith.constant 0 : i32
    %c0_i32_2 = arith.constant 0 : i32
    return %c0_i32, %c0_i32_0, %c0_i32_1 : i32, i32, i32
  }
  func.func @transform_4(%arg0: i32) -> (i32, i32) {
    %c0_i32 = arith.constant 0 : i32
    %c0_i32_0 = arith.constant 0 : i32
    %c0_i32_1 = arith.constant 0 : i32
    return %c0_i32, %c0_i32_0 : i32, i32
  }
  func.func @transform_5(%arg0: i32) -> (i32, i32) {
    %c0_i32 = arith.constant 0 : i32
    %c0_i32_0 = arith.constant 0 : i32
    %c0_i32_1 = arith.constant 0 : i32
    return %c0_i32, %c0_i32_0 : i32, i32
  }
  func.func @transform_6(%arg0: i32) -> (i32, i32) {
    %c0_i32 = arith.constant 0 : i32
    %c0_i32_0 = arith.constant 0 : i32
    %c0_i32_1 = arith.constant 0 : i32
    return %c0_i32, %c0_i32_0 : i32, i32
  }
  func.func @transform_7(%arg0: i32) -> (i32, i32) {
    %c0_i32 = arith.constant 0 : i32
    %c0_i32_0 = arith.constant 0 : i32
    %c0_i32_1 = arith.constant 0 : i32
    return %c0_i32, %c0_i32_0 : i32, i32
  }
  func.func @transform_8(%arg0: i32) -> (i32, i32) {
    %c0_i32 = arith.constant 0 : i32
    %c0_i32_0 = arith.constant 0 : i32
    %c0_i32_1 = arith.constant 0 : i32
    return %c0_i32, %c0_i32_0 : i32, i32
  }
  func.func @transform_9(%arg0: i32) -> (i32, i32) {
    %c0_i32 = arith.constant 0 : i32
    %c0_i32_0 = arith.constant 0 : i32
    %c0_i32_1 = arith.constant 0 : i32
    return %c0_i32, %c0_i32_0 : i32, i32
  }
  func.func @transform_10(%arg0: i32) -> (i32, i32) {
    %c0_i32 = arith.constant 0 : i32
    %c0_i32_0 = arith.constant 0 : i32
    return %arg0, %c0_i32 : i32, i32
  }
}

</mosaic_0001>

<bundles_post_ra>
// kernel: tile.13
= control target key start
LH: loop header
LB: loop body
LE: loop exit
PB: predicated region body
PF: predicated region fallthrough
CT: control target
= control target key end

     0   :  { %s28_s0 = inlined_call_operand.vmem [shape: f32[8], index: 0, kind: input, shape index: {}]   ;;  %s29_s1 = inlined_call_operand.vmem [shape: f32[16,8], index: 1, kind: output, shape index: {}]  }
   0x1   :  { %v4_v0 = vld [vmem:[%s28_s0] ss:$0 sm:$0xff] }
   0x2   :  { %5 = vst [vmem:[%s29_s1] sm:$0xff] %v4_v0 }
   0x3   :  { %8 = vst [vmem:[%s29_s1 + $0x8] sm:$0xff] %v4_v0 }

// kernel: tile.14
= control target key start
LH: loop header
LB: loop body
LE: loop exit
PB: predicated region body
PF: predicated region fallthrough
CT: control target
= control target key end

     0   :  { %s131_s10 = smov 120   ;;  %s132_s11 = smov 104   ;;  %vm3_vm0 = vcmask 64512   ;;  %vm9_vm1 = vcmask 1048512   ;;  %vm15_vm2 = vcmask 982912   ;;  %vm21_vm3 = vcmask 917312   ;;  %s207_s0 = inlined_call_operand.vmem [shape: f32[16,8], index: 0, kind: input, shape index: {}]   ;;  %s208_s1 = inlined_call_operand.vmem [shape: f32[1,128], index: 1, kind: output, shape index: {}]  }
   0x1   :  { %v101_v0 = vld [vmem:[%s207_s0 + $0xf] sm:$0x1]   ;;  %v103_v1 = vld [vmem:[%s207_s0 + $0xd] sm:$0x1]   ;;  %v105_v2 = vld [vmem:[%s207_s0 + $0xb] sm:$0x1]  }
   0x2   :  { %7 = vrot.lane.b32.xlu0 %v101_v0, %s131_s10  ;;  %19 = vrot.lane.b32.xlu1 %v103_v1, %s132_s11  ;;  %s133_s14 = smov 88   ;;  %v102_v3 = vld [vmem:[%s207_s0 + $0xe] sm:$0x1]   ;;  %v104_v4 = vld [vmem:[%s207_s0 + $0xc] sm:$0x1]   ;;  %s134_s19 = smov 112  }
   0x3   :  { %31 = vrot.lane.b32.xlu2 %v105_v2, %s133_s14  ;;  %s135_s20 = smov 96   ;;  %v106_v5 = vld [vmem:[%s207_s0 + $0xa] sm:$0x1]   ;;  %s136_s23 = smov 80   ;;  %v107_v6 = vld [vmem:[%s207_s0 + $0x9] sm:$0x1]  }
   0x4   :  { %v108_v7 = vld [vmem:[%s207_s0 + $0x8] sm:$0x1]   ;;  %s137_s28 = smov 72   ;;  %s138_s29 = smov 64   ;;  %v109_v8 = vld [vmem:[%s207_s0 + $0x7] sm:$0x1]  }
   0x5   :  { %s139_s3 = smov 56   ;;  %v110_v9 = vld [vmem:[%s207_s0 + $0x6] sm:$0x1]   ;;  %v111_v10 = vld [vmem:[%s207_s0 + $0x5] sm:$0x1]   ;;  %s140_s8 = smov 48  }
   0x6   :  { %s141_s9 = smov 40   ;;  %v112_v11 = vld [vmem:[%s207_s0 + $0x4] sm:$0x1]   ;;  %s142_s12 = smov 32   ;;  %v113_v12 = vld [vmem:[%s207_s0 + $0x3] sm:$0x1]  }
   0x7   :  { %v114_v13 = vld [vmem:[%s207_s0 + $0x2] sm:$0x1]   ;;  %s143_s17 = smov 24   ;;  %s144_s18 = smov 16   ;;  %v115_v14 = vld [vmem:[%s207_s0 + $0x1] sm:$0x1]  }
   0x8   :  { %s145_s21 = smov 8   ;;  %v2_v15 = vld [vmem:[%s207_s0] sm:$0x1]   ;;  %vm27_vm4 = vcmask 851712   ;;  %vm33_vm5 = vcmask 786112   ;;  %vm39_vm6 = vcmask 720512  }
   0x9   :  { %4 = vst.msk [vmem:[#allocation0] sm:$0x1] %vm3_vm0, %v2_v15   ;;  %vm45_vm7 = vcmask 654912   ;;  %vm51_vm8 = vcmask 589312   ;;  %vm57_vm9 = vcmask 523712   ;;  %vm63_vm10 = vcmask 458112  }
   0xa   :  { %13 = vrot.lane.b32.xlu0 %v102_v3, %s134_s19  ;;  %25 = vrot.lane.b32.xlu1 %v104_v4, %s135_s20  ;;  %vm69_vm11 = vcmask 392512   ;;  %vm75_vm12 = vcmask 326912   ;;  %vm81_vm13 = vcmask 261312   ;;  %vm87_vm14 = vcmask 195712  }
   0xb   :  { %37 = vrot.lane.b32.xlu2 %v106_v5, %s136_s23  ;;  %vm93_vm15 = vcmask 130112  }
  0x12   :  { %43 = vrot.lane.b32.xlu0 %v107_v6, %s137_s28  ;;  %49 = vrot.lane.b32.xlu1 %v108_v7, %s138_s29 }
  0x13   :  { %55 = vrot.lane.b32.xlu2 %v109_v8, %s139_s3 }
  0x1a   :  { %61 = vrot.lane.b32.xlu0 %v110_v9, %s140_s8  ;;  %67 = vrot.lane.b32.xlu1 %v111_v10, %s141_s9 }
  0x1b   :  { %73 = vrot.lane.b32.xlu2 %v112_v11, %s142_s12 }
  0x22   :  { %79 = vrot.lane.b32.xlu0 %v113_v12, %s143_s17  ;;  %85 = vrot.lane.b32.xlu1 %v114_v13, %s144_s18 }
  0x23   :  { %91 = vrot.lane.b32.xlu2 %v115_v14, %s145_s21 }
  0x5d   :  { %v32_v16 = vpop.permute.xlu2 %31  }
  0x65   :  { %v38_v17 = vpop.permute.xlu2 %37  }
  0x6d   :  { %v56_v18 = vpop.permute.xlu2 %55  }
  0x74   :  { %v8_v19 = vpop.permute.xlu0 %7   ;;  %v20_v20 = vpop.permute.xlu1 %19  }
  0x75   :  { %10 = vst.msk [vmem:[#allocation0] sm:$0x1] %vm9_vm1, %v8_v19   ;;  %v74_v21 = vpop.permute.xlu2 %73  }
  0x7c   :  { %v14_v22 = vpop.permute.xlu0 %13   ;;  %v26_v23 = vpop.permute.xlu1 %25  }
  0x7d   :  { %16 = vst.msk [vmem:[#allocation0] sm:$0x1] %vm15_vm2, %v14_v22   ;;  %v92_v24 = vpop.permute.xlu2 %91  }
  0x7e   :  { %22 = vst.msk [vmem:[#allocation0] sm:$0x1] %vm21_vm3, %v20_v20  }
  0x7f   :  { %28 = vst.msk [vmem:[#allocation0] sm:$0x1] %vm27_vm4, %v26_v23  }
  0x80   :  { %34 = vst.msk [vmem:[#allocation0] sm:$0x1] %vm33_vm5, %v32_v16  }
  0x81   :  { %40 = vst.msk [vmem:[#allocation0] sm:$0x1] %vm39_vm6, %v38_v17  }
  0x84   :  { %v44_v25 = vpop.permute.xlu0 %43   ;;  %v50_v26 = vpop.permute.xlu1 %49  }
  0x85   :  { %46 = vst.msk [vmem:[#allocation0] sm:$0x1] %vm45_vm7, %v44_v25  }
  0x86   :  { %52 = vst.msk [vmem:[#allocation0] sm:$0x1] %vm51_vm8, %v50_v26  }
  0x87   :  { %58 = vst.msk [vmem:[#allocation0] sm:$0x1] %vm57_vm9, %v56_v18  }
  0x8c   :  { %v62_v27 = vpop.permute.xlu0 %61   ;;  %v68_v28 = vpop.permute.xlu1 %67  }
  0x8d   :  { %64 = vst.msk [vmem:[#allocation0] sm:$0x1] %vm63_vm10, %v62_v27  }
  0x8e   :  { %70 = vst.msk [vmem:[#allocation0] sm:$0x1] %vm69_vm11, %v68_v28  }
  0x8f   :  { %76 = vst.msk [vmem:[#allocation0] sm:$0x1] %vm75_vm12, %v74_v21  }
  0x94   :  { %v80_v29 = vpop.permute.xlu0 %79   ;;  %v86_v30 = vpop.permute.xlu1 %85  }
  0x95   :  { %82 = vst.msk [vmem:[#allocation0] sm:$0x1] %vm81_vm13, %v80_v29  }
  0x96   :  { %88 = vst.msk [vmem:[#allocation0] sm:$0x1] %vm87_vm14, %v86_v30  }
  0x97   :  { %94 = vst.msk [vmem:[#allocation0] sm:$0x1] %vm93_vm15, %v92_v24  }
  0x9e   :  { %v97_v31 = vld [vmem:[#allocation0] sm:$0x1] }
  0x9f   :  { %100 = vst [vmem:[%s208_s1] sm:$0x1] %v97_v31 }

// kernel: tile.18
= control target key start
LH: loop header
LB: loop body
LE: loop exit
PB: predicated region body
PF: predicated region fallthrough
CT: control target
= control target key end

     0   :  { %s22_s0 = inlined_call_operand.vmem [shape: f32[16], index: 0, kind: input, shape index: {}]   ;;  %s23_s1 = inlined_call_operand.vmem [shape: f32[8,16], index: 1, kind: output, shape index: {}]  }
   0x1   :  { %v4_v0 = vld [vmem:[%s22_s0] ss:$0 sm:$0xff] }
   0x2   :  { %5 = vst [vmem:[%s23_s1] sm:$0xff] %v4_v0 }

// kernel: tile.19
= control target key start
LH: loop header
LB: loop body
LE: loop exit
PB: predicated region body
PF: predicated region fallthrough
CT: control target
= control target key end

     0   :  { %s67_s10 = smov 112   ;;  %s68_s11 = smov 80   ;;  %vm3_vm0 = vcmask 130048   ;;  %vm9_vm1 = vcmask 1048448   ;;  %vm15_vm2 = vcmask 917248   ;;  %vm21_vm3 = vcmask 786048   ;;  %s111_s0 = inlined_call_operand.vmem [shape: f32[8,16], index: 0, kind: input, shape index: {}]   ;;  %s112_s1 = inlined_call_operand.vmem [shape: f32[1,128], index: 1, kind: output, shape index: {}]  }
   0x1   :  { %v53_v0 = vld [vmem:[%s111_s0 + $0x7] sm:$0x1]   ;;  %v55_v1 = vld [vmem:[%s111_s0 + $0x5] sm:$0x1]   ;;  %v57_v2 = vld [vmem:[%s111_s0 + $0x3] sm:$0x1]  }
   0x2   :  { %7 = vrot.lane.b32.xlu0 %v53_v0, %s67_s10  ;;  %19 = vrot.lane.b32.xlu1 %v55_v1, %s68_s11  ;;  %s69_s14 = smov 48   ;;  %v54_v3 = vld [vmem:[%s111_s0 + $0x6] sm:$0x1]   ;;  %v56_v4 = vld [vmem:[%s111_s0 + $0x4] sm:$0x1]   ;;  %s70_s21 = smov 96  }
   0x3   :  { %31 = vrot.lane.b32.xlu2 %v57_v2, %s69_s14  ;;  %v58_v5 = vld [vmem:[%s111_s0 + $0x2] sm:$0x1]   ;;  %s71_s22 = smov 64   ;;  %s72_s23 = smov 32   ;;  %v59_v6 = vld [vmem:[%s111_s0 + $0x1] sm:$0x1]  }
   0x4   :  { %s73_s26 = smov 16   ;;  %v2_v7 = vld [vmem:[%s111_s0] sm:$0x1]   ;;  %vm27_vm4 = vcmask 654848   ;;  %vm33_vm5 = vcmask 523648   ;;  %vm39_vm6 = vcmask 392448  }
   0x5   :  { %4 = vst.msk [vmem:[#allocation0] sm:$0x1] %vm3_vm0, %v2_v7   ;;  %vm45_vm7 = vcmask 261248  }
   0xa   :  { %13 = vrot.lane.b32.xlu0 %v54_v3, %s70_s21  ;;  %25 = vrot.lane.b32.xlu1 %v56_v4, %s71_s22 }
   0xb   :  { %37 = vrot.lane.b32.xlu2 %v58_v5, %s72_s23 }
  0x12   :  { %43 = vrot.lane.b32.xlu0 %v59_v6, %s73_s26 }
  0x5d   :  { %v32_v8 = vpop.permute.xlu2 %31  }
  0x65   :  { %v38_v9 = vpop.permute.xlu2 %37  }
  0x74   :  { %v8_v10 = vpop.permute.xlu0 %7   ;;  %v20_v11 = vpop.permute.xlu1 %19  }
  0x75   :  { %10 = vst.msk [vmem:[#allocation0] sm:$0x1] %vm9_vm1, %v8_v10  }
  0x7c   :  { %v14_v12 = vpop.permute.xlu0 %13   ;;  %v26_v13 = vpop.permute.xlu1 %25  }
  0x7d   :  { %16 = vst.msk [vmem:[#allocation0] sm:$0x1] %vm15_vm2, %v14_v12  }
  0x7e   :  { %22 = vst.msk [vmem:[#allocation0] sm:$0x1] %vm21_vm3, %v20_v11  }
  0x7f   :  { %28 = vst.msk [vmem:[#allocation0] sm:$0x1] %vm27_vm4, %v26_v13  }
  0x80   :  { %34 = vst.msk [vmem:[#allocation0] sm:$0x1] %vm33_vm5, %v32_v8  }
  0x81   :  { %40 = vst.msk [vmem:[#allocation0] sm:$0x1] %vm39_vm6, %v38_v9  }
  0x84   :  { %v44_v14 = vpop.permute.xlu0 %43  }
  0x85   :  { %46 = vst.msk [vmem:[#allocation0] sm:$0x1] %vm45_vm7, %v44_v14  }
  0x8c   :  { %v49_v15 = vld [vmem:[#allocation0] sm:$0x1] }
  0x8d   :  { %52 = vst [vmem:[%s112_s1] sm:$0x1] %v49_v15 }

// kernel: feature_net_forward.1
= control target key start
LH: loop header
LB: loop body
LE: loop exit
PB: predicated region body
PF: predicated region fallthrough
CT: control target
= control target key end

     0   :  { %s1500_s0 = inlined_call_operand.vmem [shape: bf16[36,64], index: 0, kind: input, shape index: {}]   ;;  %s1501_s1 = inlined_call_operand.vmem [shape: bf16[3,64,128], index: 1, kind: input, shape index: {}]   ;;  %s1502_s2 = inlined_call_operand.vmem [shape: f32[1,128], index: 2, kind: input, shape index: {}]   ;;  %s1503_s3 = inlined_call_operand.vmem [shape: bf16[3,64,128], index: 3, kind: input, shape index: {}]   ;;  %s1504_s4 = inlined_call_operand.vmem [shape: f32[1,128], index: 4, kind: input, shape index: {}]   ;;  %s1505_s5 = inlined_call_operand.vmem [shape: bf16[128,128], index: 5, kind: input, shape index: {}]   ;;  %s1506_s6 = inlined_call_operand.vmem [shape: bf16[128,128], index: 6, kind: input, shape index: {}]   ;;  %s1507_s7 = inlined_call_operand.vmem [shape: bf16[20,33], index: 7, kind: input, shape index: {}]   ;;  %s1508_s8 = inlined_call_operand.vmem [shape: bf16[2,17], index: 8, kind: input, shape index: {}]   ;;  %s1509_s9 = inlined_call_operand.vmem [shape: bf16[64,16], index: 9, kind: input, shape index: {}]   ;;  %s1510_s10 = inlined_call_operand.hbm [shape: f32[2,16], index: 10, kind: output, shape index: {}]  }
   0x1   :  { %v1146_v0 = vld [vmem:[%s1501_s1 + $0x38] sm:$0xff]  ;;  %v1145_v3 = vld [vmem:[%s1501_s1 + $0x30] sm:$0xff]  ;;  %v1185_v6 = vld [vmem:[%s1500_s0] sm:$0xff]  }
   0x2   :  { %v1142_v1 = vld [vmem:[%s1501_s1 + $0x18] sm:$0xff]  ;;  %135 = vmatpush.bf16.msra.mxu0 %v1146_v0  ;;  %v1141_v4 = vld [vmem:[%s1501_s1 + $0x10] sm:$0xff]  ;;  %v1138_v7 = vld [vmem:[%s1500_s0 + $0x8] sm:$0xff]  ;;  %v77_v11 = vshll.u32 %v1185_v6, 16  ;;  %v75_v13 = vshrl.u32 %v1185_v6, 16 }
   0x3   :  { %v1150_v2 = vld [vmem:[%s1501_s1 + $0x58] sm:$0xff]  ;;  %192 = vmatpush.bf16.msra.mxu1 %v1142_v1  ;;  %v1149_v5 = vld [vmem:[%s1501_s1 + $0x50] sm:$0xff]  ;;  %v1188_v8 = vld [vmem:[%s1500_s0] sm:$0xf0]  ;;  %v82_v14 = vshll.u32 %v1138_v7, 16 }
   0x4   :  { %267 = vmatpush.bf16.msra.mxu2 %v1150_v2  ;;  %v1144_v9 = vld [vmem:[%s1501_s1 + $0x28] sm:$0xff]  ;;  %v1189_v12 = vld [vmem:[%s1500_s0] sm:$0xe]  ;;  %v79_v16 = vrot.slane %v77_v11, 1 }
   0x5   :  { %v1140_v10 = vld [vmem:[%s1501_s1 + $0x8] sm:$0xff]  ;;  %v1190_v17 = vor.u32 %v1189_v12, %v1188_v8 }
   0x6   :  { %136 = vmatpush.bf16.msra.mxu0 %v1145_v3  ;;  %v1148_v15 = vld [vmem:[%s1501_s1 + $0x48] sm:$0xff] }
   0x7   :  { %193 = vmatpush.bf16.msra.mxu1 %v1141_v4 }
   0x8   :  { %268 = vmatpush.bf16.msra.mxu2 %v1149_v5 }
   0x9   :  { %15 = vsyncpa [#allocation3], 0  ;;  %v1143_v18 = vld [vmem:[%s1501_s1 + $0x20] sm:$0xff]  ;;  %vm73_vm0 = vsmask.f32 7424  ;;  %v80_v20 = vor.u32 %v79_v16, %v75_v13  ;;  %v84_v21 = vrot.slane %v82_v14, 1 }
   0xa   :  { %137 = vmatpush.bf16.msra.mxu0 %v1144_v9  ;;  %v1139_v19 = vld [vmem:[%s1501_s1] sm:$0xff]  ;;  %v225_v23 = vrot.slane %v1190_v17, 1  ;;  %v226_v24 = vrot.slane %v1138_v7, 1  ;;  %v50_v25 = vld [vmem:[%s1500_s0 + $0x10] sm:$0x3]  ;;  %vm224_vm1 = vcmask 1046528  }
   0xb   :  { %194 = vmatpush.bf16.msra.mxu1 %v1140_v10  ;;  %v1147_v22 = vld [vmem:[%s1501_s1 + $0x40] sm:$0xff]  ;;  %v85_v26 = vsel %vm73_vm0, %v80_v20, %v84_v21  ;;  %vm121_vm2 = vcmask 523264   ;;  %v69_v27 = vunpack.c.l.b16 %v50_v25  ;;  %v1158_v30 = vld [vmem:[%s1505_s5 + $0x38] sm:$0xff]  ;;  %v1157_v31 = vld [vmem:[%s1505_s5 + $0x30] sm:$0xff]  ;;  %v86_v32 = vshrl.u32 %v1138_v7, 16  ;;  %s1239_s27 = smov [#allocation2]  }
   0xc   :  { %269 = vmatpush.bf16.msra.mxu2 %v1148_v15  ;;  %v227_v28 = vsel %vm224_vm1, %v225_v23, %v226_v24  ;;  %372 = vmatpush.bf16.msra.mxu3 %v1158_v30  ;;  %v41_v39 = vld [vmem:[%s1500_s0 + $0x10] sm:$0x1]  ;;  %v1156_v44 = vld [vmem:[%s1505_s5 + $0x28] sm:$0xff]  ;;  %v1155_v45 = vld [vmem:[%s1505_s5 + $0x20] sm:$0xff]  ;;  %vm466_vm3 = vcmask 1040384   ;;  %vm459_vm4 = vcmask 269312  }
   0xd   :  { %v72_v29 = vpack.c.b16 %v69_v27, %v69_v27  ;;  %v88_v34 = vor.u32 %v86_v32, %v84_v21  ;;  %v155_v41 = vunpack.c.l.b16 %v41_v39  ;;  %v1154_v46 = vld [vmem:[%s1505_s5 + $0x18] sm:$0xff]  ;;  %v1153_v47 = vld [vmem:[%s1505_s5 + $0x10] sm:$0xff]  ;;  %v1152_v48 = vld [vmem:[%s1505_s5 + $0x8] sm:$0xff]  ;;  %vm816_vm5 = vcmask 138240   ;;  %s892_s28 = sshll.u32 %s1239_s27, 4  ;;  %s894_s30 = sshll.u32 %s1510_s10, 4  ;;  %s893_s28 = int_to_ptr.vmem [resolvable:$true] %s892_s28  ;;  %s895_s30 = int_to_ptr.hbm [resolvable:$true] %s894_s30 }
   0xe   :  { %138 = vmatpush.bf16.msra.mxu0 %v1143_v18  ;;  %v1151_v49 = vld [vmem:[%s1505_s5] sm:$0xff]  ;;  %vm885_vm6 = vcmask 123904  }
   0xf   :  { %195 = vmatpush.bf16.msra.mxu1 %v1139_v19  ;;  %v90_v33 = vshll.u32 %v72_v29, 16  ;;  %v228_v36 = vrot.slane %v72_v29, 1  ;;  %v94_v40 = vshrl.u32 %v72_v29, 16  ;;  %v156_v43 = vpack.c.b16 %v155_v41, %v155_v41  ;;  %v1209_v57 = vld [vmem:[%s1502_s2] ss:$0 sm:$0xff]  ;;  %s1237_s2 = smov 64  }
  0x10   :  { %270 = vmatpush.bf16.msra.mxu2 %v1147_v22  ;;  %373 = vmatpush.bf16.msra.mxu3 %v1157_v31 }
  0x11   :  { %931 = vmatmul.msk.bf16.vlgmr.msra.gmra.mxu0 %vm121_vm2, %v85_v26  ;;  %v92_v35 = vrot.slane %v90_v33, 1  ;;  %v229_v38 = vsel %vm224_vm1, %v226_v24, %v228_v36 }
  0x12   :  { %950 = vmatmul.msk.bf16.vlgmr.msra.gmra.mxu1 %vm121_vm2, %v1185_v6 }
  0x13   :  { %977 = vmatmul.msk.bf16.vlgmr.msra.gmra.mxu2 %vm121_vm2, %v227_v28  ;;  %v93_v37 = vsel %vm73_vm0, %v88_v34, %v92_v35  ;;  %v96_v42 = vor.u32 %v94_v40, %v92_v35 }
  0x14   :  { %374 = vmatpush.bf16.msra.mxu3 %v1156_v44 }
  0x18   :  { %375 = vmatpush.bf16.msra.mxu3 %v1155_v45  ;;  %v1238_v45 = vmov 0  }
  0x1c   :  { %376 = vmatpush.bf16.msra.mxu3 %v1154_v46  ;;  %v1392_v46 = vsel %vm466_vm3, 65535, %v1238_v45  ;;  %v1178_v45 = vld [vmem:[%s1506_s6 + $0x30] sm:$0xff] }
  0x20   :  { %377 = vmatpush.bf16.msra.mxu3 %v1153_v47 }
  0x21   :  { %932 = vmatmul.msk.bf16.gmra.mxu0 %vm121_vm2, %v93_v37 }
  0x22   :  { %951 = vmatmul.msk.bf16.gmra.mxu1 %vm121_vm2, %v1138_v7 }
  0x23   :  { %978 = vmatmul.msk.bf16.gmra.mxu2 %vm121_vm2, %v229_v38 }
  0x24   :  { %378 = vmatpush.bf16.msra.mxu3 %v1152_v48 }
  0x28   :  { %379 = vmatpush.bf16.msra.mxu3 %v1151_v49 }
  0x31   :  { %933 = vmatmul.msk.bf16.gmra.mxu0 %vm121_vm2, %v96_v42 }
  0x32   :  { %952 = vmatmul.msk.bf16.gmra.mxu1 %vm121_vm2, %v156_v43 }
  0x33   :  { %979 = vmatmul.msk.bf16.gmra.mxu2 %vm121_vm2, %v228_v36 }
  0x8e   :  { %v140_v50 = vpop.f32.mrf.mxu0 }
  0x8f   :  { %v197_v51 = vpop.f32.mrf.mxu1 }
  0x90   :  { %v198_v53 = vadd.f32 %v197_v51, %v140_v50 }
  0x96   :  { %v272_v52 = vpop.f32.mrf.mxu2  ;;  %v142_v54 = vpop.f32.mrf.mxu0 }
  0x97   :  { %v199_v55 = vpop.f32.mrf.mxu1  ;;  %v286_v56 = vadd.f32 %v272_v52, %v198_v53 }
  0x98   :  { %v200_v58 = vadd.f32 %v199_v55, %v142_v54 }
  0x99   :  { %v295_v60 = vadd.f32 %v1209_v57, %v286_v56 }
  0x9b   :  { %v300_v1 = vmax.f32 %v295_v60, 0.0 }
  0x9e   :  { %v274_v59 = vpop.f32.mrf.mxu2  ;;  %v145_v62 = vpop.f32.mrf.mxu0 }
  0x9f   :  { %v287_v61 = vadd.f32 %v274_v59, %v200_v58  ;;  %v202_v63 = vpop.f32.mrf.mxu1 }
  0xa0   :  { %v203_v5 = vadd.f32 %v202_v63, %v145_v62 }
  0xa1   :  { %v296_v0 = vadd.f32 %v1209_v57, %v287_v61 }
  0xa3   :  { %v301_v2 = vmax.f32 %v296_v0, 0.0 }
  0xa5   :  { %v305_v3 = vpack.c.bf16 %v301_v2, %v300_v1 }
  0xa6   :  { %v277_v4 = vpop.f32.mrf.mxu2  ;;  %v147_v6 = vpop.f32.mrf.mxu0 }
  0xa7   :  { %380 = vmatmul.bf16.vlgmr.msra.gmra.mxu3 %v305_v3  ;;  %v204_v7 = vpop.f32.mrf.mxu1  ;;  %v288_v8 = vadd.f32 %v277_v4, %v203_v5  ;;  %v1159_v4 = vld [vmem:[%s1507_s7] sm:$0xff]  ;;  %v447_v5 = vld [vmem:[%s1507_s7 + $0x8] sm:$0x3] }
  0xa8   :  { %v205_v9 = vadd.f32 %v204_v7, %v147_v6  ;;  %v456_v6 = vunpack.c.l.b16 %v447_v5 }
  0xa9   :  { %v297_v11 = vadd.f32 %v1209_v57, %v288_v8  ;;  %v1163_v8 = vld [vmem:[%s1503_s3 + $0x18] sm:$0xff] }
  0xaa   :  { %v458_v7 = vpack.c.b16 %v456_v6, %v456_v6  ;;  %613 = vmatpush.bf16.msrb.mxu2 %v1163_v8 }
  0xab   :  { %v302_v16 = vmax.f32 %v297_v11, 0.0  ;;  %v1171_v11 = vld [vmem:[%s1503_s3 + $0x58] sm:$0xff] }
  0xac   :  { %673 = vmatpush.bf16.msrb.mxu3 %v1171_v11 }
  0xae   :  { %v279_v10 = vpop.f32.mrf.mxu2  ;;  %v150_v13 = vpop.f32.mrf.mxu0 }
  0xaf   :  { %v289_v12 = vadd.f32 %v279_v10, %v205_v9  ;;  %v207_v14 = vpop.f32.mrf.mxu1  ;;  %v1162_v9 = vld [vmem:[%s1503_s3 + $0x10] sm:$0xff]  ;;  %v1161_v10 = vld [vmem:[%s1503_s3 + $0x8] sm:$0xff] }
  0xb0   :  { %v208_v18 = vadd.f32 %v207_v14, %v150_v13  ;;  %614 = vmatpush.bf16.msrb.mxu2 %v1162_v9  ;;  %v1167_v13 = vld [vmem:[%s1503_s3 + $0x38] sm:$0xff]  ;;  %v1170_v14 = vld [vmem:[%s1503_s3 + $0x50] sm:$0xff] }
  0xb1   :  { %v298_v15 = vadd.f32 %v1209_v57, %v289_v12  ;;  %v1160_v12 = vld [vmem:[%s1503_s3] sm:$0xff]  ;;  %567 = vmatpush.bf16.msrb.mxu1 %v1167_v13  ;;  %674 = vmatpush.bf16.msrb.mxu3 %v1170_v14 }
  0xb3   :  { %v303_v17 = vmax.f32 %v298_v15, 0.0  ;;  %v1166_v15 = vld [vmem:[%s1503_s3 + $0x30] sm:$0xff] }
  0xb4   :  { %615 = vmatpush.bf16.msrb.mxu2 %v1161_v10 }
  0xb5   :  { %v306_v19 = vpack.c.bf16 %v303_v17, %v302_v16  ;;  %568 = vmatpush.bf16.msrb.mxu1 %v1166_v15  ;;  %v1169_v16 = vld [vmem:[%s1503_s3 + $0x48] sm:$0xff] }
  0xb6   :  { %v282_v20 = vpop.f32.mrf.mxu2  ;;  %v152_v22 = vpop.f32.mrf.mxu0  ;;  %675 = vmatpush.bf16.msrb.mxu3 %v1169_v16  ;;  %v1165_v17 = vld [vmem:[%s1503_s3 + $0x28] sm:$0xff] }
  0xb7   :  { %v290_v21 = vadd.f32 %v282_v20, %v208_v18  ;;  %385 = vmatmul.bf16.gmra.mxu3 %v306_v19  ;;  %v209_v23 = vpop.f32.mrf.mxu1  ;;  %v1168_v18 = vld [vmem:[%s1503_s3 + $0x40] sm:$0xff] }
  0xb8   :  { %616 = vmatpush.bf16.msrb.mxu2 %v1160_v12  ;;  %v1164_v19 = vld [vmem:[%s1503_s3 + $0x20] sm:$0xff] }
  0xb9   :  { %v299_v24 = vadd.f32 %v1209_v57, %v290_v21  ;;  %569 = vmatpush.bf16.msrb.mxu1 %v1165_v17 }
  0xba   :  { %676 = vmatpush.bf16.msrb.mxu3 %v1168_v18 }
  0xbb   :  { %v304_v26 = vmax.f32 %v299_v24, 0.0 }
  0xbd   :  { %v307_v27 = vpack.c.bf16 %v304_v26, %v304_v26  ;;  %570 = vmatpush.bf16.msrb.mxu1 %v1164_v19  ;;  %v1179_v26 = vld [vmem:[%s1506_s6 + $0x38] sm:$0xff] }
  0xbe   :  { %v284_v25 = vpop.f32.mrf.mxu2 }
  0xc7   :  { %390 = vmatmul.bf16.gmra.mxu3 %v307_v27 }
 0x12a   :  { %v381_v28 = vpop.f32.mrf.mxu3 }
 0x132   :  { %v383_v29 = vpop.f32.mrf.mxu3 }
 0x133   :  { %402 = vrot.lane.b32.xlu1 %v383_v29, %s1237_s2 }
 0x13a   :  { %v386_v30 = vpop.f32.mrf.mxu3 }
 0x142   :  { %v388_v31 = vpop.f32.mrf.mxu3 }
 0x143   :  { %v1199_v35 = vpack.i.bf16 %v381_v28, %v388_v31 }
 0x14a   :  { %v391_v32 = vpop.f32.mrf.mxu3 }
 0x14b   :  { %v1194_v33 = vpack.i.bf16 %v386_v30, %v391_v32 }
 0x14d   :  { %1195 = vrot.lane.b32.xlu0 %v1194_v33, %s1237_s2 }
 0x152   :  { %v393_v34 = vpop.f32.mrf.mxu3 }
 0x155   :  { %1200 = vrot.lane.b32.xlu0 %v1199_v35, %s1237_s2 }
 0x1a5   :  { %v403_v39 = vpop.permute.xlu1 %402 }
 0x1a6   :  { %v416_v43 = vmax.f32 %v383_v29, %v403_v39 }
 0x1a8   :  { %v427_v54 = vrot.slane %v416_v43, 1 }
 0x1bf   :  { %v1196_v36 = vpop.permute.xlu0 %1195 }
 0x1c0   :  { %v1197_v37 = vunpack.i.l.bf16 %v1196_v36  ;;  %v1198_v40 = vunpack.i.h.bf16 %v1196_v36 }
 0x1c2   :  { %v419_v38 = vmax.f32 %v391_v32, %v1197_v37  ;;  %v417_v47 = vmax.f32 %v386_v30, %v1198_v40 }
 0x1c4   :  { %v433_v41 = vrot.slane %v419_v38, 1  ;;  %v429_v55 = vrot.slane %v417_v47, 1 }
 0x1c6   :  { %v444_v42 = vmax.f32 %v419_v38, %v433_v41  ;;  %v430_v63 = vsel %vm224_vm1, %v427_v54, %v429_v55 }
 0x1c7   :  { %v1201_v44 = vpop.permute.xlu0 %1200  ;;  %v441_v2 = vmax.f32 %v416_v43, %v430_v63 }
 0x1c8   :  { %v1203_v48 = vunpack.i.h.bf16 %v1201_v44  ;;  %v1202_v49 = vunpack.i.l.bf16 %v1201_v44  ;;  %v450_v50 = vpack.c.bf16 %v444_v42, %v444_v42 }
 0x1ca   :  { %v415_v51 = vmax.f32 %v381_v28, %v1203_v48  ;;  %v418_v52 = vmax.f32 %v388_v31, %v1202_v49  ;;  %v470_v53 = vand.u32 %v1392_v46, %v450_v50  ;;  %v1176_v48 = vld [vmem:[%s1506_s6 + $0x20] sm:$0xff]  ;;  %v1175_v49 = vld [vmem:[%s1506_s6 + $0x18] sm:$0xff]  ;;  %v1174_v50 = vld [vmem:[%s1506_s6 + $0x10] sm:$0xff] }
 0x1cc   :  { %v426_v56 = vrot.slane %v415_v51, 1  ;;  %v431_v57 = vrot.slane %v418_v52, 1  ;;  %477 = vmatpush.bf16.msrb.mxu0 %v470_v53 }
 0x1ce   :  { %v432_v58 = vsel %vm224_vm1, %v429_v55, %v431_v57  ;;  %v434_v59 = vsel %vm224_vm1, %v431_v57, %v433_v41  ;;  %v428_v60 = vsel %vm224_vm1, %v426_v56, %v427_v54 }
 0x1cf   :  { %v442_v61 = vmax.f32 %v417_v47, %v432_v58  ;;  %v443_v62 = vmax.f32 %v418_v52, %v434_v59  ;;  %v440_v1 = vmax.f32 %v415_v51, %v428_v60  ;;  %v1177_v47 = vld [vmem:[%s1506_s6 + $0x28] sm:$0xff]  ;;  %v1172_v52 = vld [vmem:[%s1506_s6] sm:$0xff] }
 0x1d0   :  { %v1173_v51 = vld [vmem:[%s1506_s6 + $0x8] sm:$0xff]  ;;  %v1210_v60 = vld [vmem:[%s1504_s4] ss:$0 sm:$0xff] }
 0x1d1   :  { %v449_v0 = vpack.c.bf16 %v443_v62, %v442_v61  ;;  %v448_v3 = vpack.c.bf16 %v441_v2, %v440_v1 }
 0x1d3   :  { %478 = vmatpush.bf16.msrb.mxu0 %v449_v0 }
 0x1d7   :  { %479 = vmatpush.bf16.msrb.mxu0 %v448_v3 }
 0x1da   :  { %1016 = vmatmul.msk.bf16.vlgmr.msrb.gmra.mxu0 %vm459_vm4, %v1159_v4 }
 0x1db   :  { %766 = vmatpush.bf16.msra.mxu0 %v1179_v26 }
 0x1df   :  { %767 = vmatpush.bf16.msra.mxu0 %v1178_v45 }
 0x1e3   :  { %768 = vmatpush.bf16.msra.mxu0 %v1177_v47 }
 0x1e7   :  { %769 = vmatpush.bf16.msra.mxu0 %v1176_v48 }
 0x1ea   :  { %1017 = vmatmul.msk.bf16.gmra.mxu0 %vm459_vm4, %v458_v7 }
 0x1eb   :  { %770 = vmatpush.bf16.msra.mxu0 %v1175_v49 }
 0x1ef   :  { %771 = vmatpush.bf16.msra.mxu0 %v1174_v50 }
 0x1f3   :  { %772 = vmatpush.bf16.msra.mxu0 %v1173_v51 }
 0x1f7   :  { %773 = vmatpush.bf16.msra.mxu0 %v1172_v52 }
 0x257   :  { %v481_v20 = vpop.f32.mrf.mxu0 }
 0x258   :  { %v490_v21 = vpack.c.bf16 %v481_v20, %v481_v20 }
 0x25a   :  { %v513_v24 = vunpack.c.l.b16 %v490_v21  ;;  %v1183_v21 = vld [vmem:[%s1509_s9 + $0x18] sm:$0xff] }
 0x25b   :  { %876 = vmatpush.bf16.msra.mxu2 %v1183_v21 }
 0x25f   :  { %v483_v22 = vpop.f32.mrf.mxu0 }
 0x260   :  { %v491_v23 = vpack.c.bf16 %v483_v22, %v483_v22  ;;  %v1182_v22 = vld [vmem:[%s1509_s9 + $0x10] sm:$0xff] }
 0x261   :  { %877 = vmatpush.bf16.msra.mxu2 %v1182_v22 }
 0x262   :  { %v514_v25 = vunpack.c.l.b16 %v491_v23  ;;  %v1181_v23 = vld [vmem:[%s1509_s9 + $0x8] sm:$0xff] }
 0x264   :  { %v516_v27 = vpack.c.b16 %v514_v25, %v513_v24 }
 0x265   :  { %878 = vmatpush.bf16.msra.mxu2 %v1181_v23 }
 0x266   :  { %1060 = vmatmul.msk.bf16.vlgmr.msrb.gmra.mxu2 %vm121_vm2, %v516_v27  ;;  %v521_v30 = vshll.u32 %v516_v27, 16  ;;  %v636_v34 = vrot.slane %v516_v27, 1  ;;  %v519_v36 = vshrl.u32 %v516_v27, 16 }
 0x267   :  { %v486_v28 = vpop.f32.mrf.mxu0 }
 0x268   :  { %v492_v29 = vpack.c.bf16 %v486_v28, %v486_v28  ;;  %v523_v33 = vrot.slane %v521_v30, 1 }
 0x26a   :  { %v515_v31 = vunpack.c.l.b16 %v492_v29  ;;  %v524_v40 = vor.u32 %v523_v33, %v519_v36 }
 0x26c   :  { %v517_v32 = vpack.c.b16 %v515_v31, %v515_v31 }
 0x26e   :  { %v637_v35 = vrot.slane %v517_v32, 1  ;;  %v526_v37 = vshll.u32 %v517_v32, 16  ;;  %v530_v43 = vshrl.u32 %v517_v32, 16 }
 0x26f   :  { %v488_v38 = vpop.f32.mrf.mxu0 }
 0x270   :  { %v638_v39 = vsel %vm224_vm1, %v636_v34, %v637_v35  ;;  %v528_v41 = vrot.slane %v526_v37, 1 }
 0x271   :  { %1086 = vmatmul.msk.bf16.vlgmr.msrb.gmra.mxu3 %vm121_vm2, %v638_v39 }
 0x272   :  { %v529_v42 = vsel %vm73_vm0, %v524_v40, %v528_v41  ;;  %v532_v44 = vor.u32 %v530_v43, %v528_v41  ;;  %v1180_v43 = vld [vmem:[%s1509_s9] sm:$0xff] }
 0x273   :  { %1042 = vmatmul.msk.bf16.vlgmr.msrb.gmra.mxu1 %vm121_vm2, %v529_v42  ;;  %v813_v42 = vld [vmem:[%s1508_s8] sm:$0x1]  ;;  %879 = vmatpush.bf16.msra.mxu2 %v1180_v43 }
 0x276   :  { %1061 = vmatmul.msk.bf16.gmra.mxu2 %vm121_vm2, %v517_v32 }
 0x281   :  { %1087 = vmatmul.msk.bf16.gmra.mxu3 %vm121_vm2, %v637_v35 }
 0x283   :  { %1043 = vmatmul.msk.bf16.gmra.mxu1 %vm121_vm2, %v532_v44 }
 0x2e9   :  { %v618_v53 = vpop.f32.mrf.mxu2 }
 0x2f0   :  { %v572_v54 = vpop.f32.mrf.mxu1 }
 0x2f1   :  { %v620_v55 = vpop.f32.mrf.mxu2  ;;  %v619_v57 = vadd.f32 %v618_v53, %v572_v54 }
 0x2f4   :  { %v678_v56 = vpop.f32.mrf.mxu3 }
 0x2f5   :  { %v687_v59 = vadd.f32 %v678_v56, %v619_v57 }
 0x2f7   :  { %v694_v0 = vadd.f32 %v1210_v60, %v687_v59 }
 0x2f8   :  { %v574_v58 = vpop.f32.mrf.mxu1 }
 0x2f9   :  { %v623_v61 = vpop.f32.mrf.mxu2  ;;  %v621_v62 = vadd.f32 %v620_v55, %v574_v58  ;;  %v697_v4 = vmax.f32 %v694_v0, 0.0 }
 0x2fc   :  { %v680_v63 = vpop.f32.mrf.mxu3 }
 0x2fd   :  { %v688_v1 = vadd.f32 %v680_v63, %v621_v62 }
 0x2ff   :  { %v695_v2 = vadd.f32 %v1210_v60, %v688_v1 }
 0x300   :  { %v577_v3 = vpop.f32.mrf.mxu1 }
 0x301   :  { %v698_v5 = vmax.f32 %v695_v2, 0.0  ;;  %v625_v6 = vpop.f32.mrf.mxu2  ;;  %v624_v9 = vadd.f32 %v623_v61, %v577_v3 }
 0x303   :  { %v700_v7 = vpack.c.bf16 %v698_v5, %v697_v4 }
 0x304   :  { %v683_v8 = vpop.f32.mrf.mxu3 }
 0x305   :  { %774 = vmatmul.bf16.vlgmr.msra.gmra.mxu0 %v700_v7  ;;  %v689_v10 = vadd.f32 %v683_v8, %v624_v9 }
 0x307   :  { %v696_v12 = vadd.f32 %v1210_v60, %v689_v10 }
 0x308   :  { %v579_v11 = vpop.f32.mrf.mxu1 }
 0x309   :  { %v699_v14 = vmax.f32 %v696_v12, 0.0 }
 0x30b   :  { %v701_v15 = vpack.c.bf16 %v699_v14, %v699_v14 }
 0x30c   :  { %v685_v13 = vpop.f32.mrf.mxu3 }
 0x315   :  { %779 = vmatmul.bf16.gmra.mxu0 %v701_v15 }
 0x382   :  { %v775_v16 = vpop.f32.mrf.mxu0 }
 0x38a   :  { %v777_v17 = vpop.f32.mrf.mxu0 }
 0x38b   :  { %789 = vrot.lane.b32.xlu2 %v777_v17, %s1237_s2 }
 0x392   :  { %v780_v18 = vpop.f32.mrf.mxu0 }
 0x393   :  { %v1204_v19 = vpack.i.bf16 %v775_v16, %v780_v18 }
 0x395   :  { %1205 = vrot.lane.b32.xlu1 %v1204_v19, %s1237_s2 }
 0x39a   :  { %v782_v20 = vpop.f32.mrf.mxu0 }
 0x3e5   :  { %v790_v24 = vpop.permute.xlu2 %789 }
 0x3e6   :  { %v797_v28 = vmax.f32 %v777_v17, %v790_v24 }
 0x3e8   :  { %v803_v33 = vrot.slane %v797_v28, 1 }
 0x407   :  { %v1206_v25 = vpop.permute.xlu1 %1205 }
 0x408   :  { %v1208_v26 = vunpack.i.h.bf16 %v1206_v25  ;;  %v1207_v27 = vunpack.i.l.bf16 %v1206_v25 }
 0x40a   :  { %v796_v29 = vmax.f32 %v775_v16, %v1208_v26  ;;  %v798_v30 = vmax.f32 %v780_v18, %v1207_v27 }
 0x40c   :  { %v802_v31 = vrot.slane %v796_v29, 1  ;;  %v805_v32 = vrot.slane %v798_v30, 1 }
 0x40e   :  { %v812_v34 = vmax.f32 %v798_v30, %v805_v32  ;;  %v804_v35 = vsel %vm224_vm1, %v802_v31, %v803_v33  ;;  %v806_v36 = vsel %vm224_vm1, %v803_v33, %v805_v32 }
 0x40f   :  { %v810_v38 = vmax.f32 %v796_v29, %v804_v35  ;;  %v811_v40 = vmax.f32 %v797_v28, %v806_v36 }
 0x410   :  { %v815_v37 = vpack.c.bf16 %v812_v34, %v812_v34 }
 0x411   :  { %v814_v41 = vpack.c.bf16 %v811_v40, %v810_v38 }
 0x412   :  { %v821_v39 = vand.u32 %v815_v37, %v1392_v46 }
 0x414   :  { %829 = vmatpush.bf16.msra.mxu1 %v821_v39 }
 0x418   :  { %830 = vmatpush.bf16.msra.mxu1 %v814_v41 }
 0x41b   :  { %1120 = vmatmul.msk.bf16.vlgmr.msra.gmra.mxu1 %vm816_vm5, %v813_v42 }
 0x498   :  { %v832_v44 = vpop.f32.mrf.mxu1 }
 0x499   :  { %v836_v45 = vpack.c.bf16 %v832_v44, %v832_v44 }
 0x49b   :  { %1137 = vmatmul.msk.bf16.vlgmr.msra.gmra.mxu2 %vm121_vm2, %v836_v45 }
 0x4a0   :  { %v834_v46 = vpop.f32.mrf.mxu1 }
 0x51e   :  { %v881_v47 = vpop.f32.mrf.mxu2 }
 0x51f   :  { %886 = vst.msk [vmem:[#allocation2] sm:$0x3] %vm885_vm6, %v881_v47 }
 0x520   :  { %897 = dma.vmem_to_hbm [thread:$0]  %s893_s28, 32, %s895_s30, [#allocation3]  }
 0x526   :  { %v883_v48 = vpop.f32.mrf.mxu2 }
 0x527   :  { %1235 = dma.done.wait [#allocation3], 32  }
 0x528   :  { %1236 = vsyncadd [#allocation3], 4294967264 }
 0x529   :  { %902 = vsyncpa [#allocation3], 1 }

</bundles_post_ra>
